<compile_context>
chip_gen: v5e
topology: v5e:2x2
jax: 0.10.0
libtpu: 0.0.40
codegen_flags: <defaults>
</compile_context>

<pallas_src>
import functools

import jax
import jax.numpy as jnp
import numpy as np
from jax import lax
from jax.experimental import pallas as pl
from jax.experimental.pallas import tpu as pltpu

HIDDEN = 16


def _round_up(x, m):
    return ((x + m - 1) // m) * m


def critic_kernel(s_ref, a_ref, w1s_ref, w1a_ref, b1_ref, w2_ref, b2_ref,
                  w3_ref, b3_ref, o_ref):
    # fc1 over the (virtually) concatenated [state, action] input: the concat is
    # fused by splitting W1 into its state / action row blocks.
    h1 = (jnp.dot(s_ref[...], w1s_ref[...], preferred_element_type=jnp.float32)
          + jnp.dot(a_ref[...], w1a_ref[...], preferred_element_type=jnp.float32)
          + b1_ref[...])
    h1 = jnp.maximum(h1, 0.0)                                          # relu

    # fc2
    h2 = jnp.dot(h1, w2_ref[...], preferred_element_type=jnp.float32) + b2_ref[...]
    h2 = jnp.maximum(h2, 0.0)                                          # relu

    # fc3: w3 is [1, 16] (PyTorch [out, in] layout). Contract both operands on their
    # last axis (A @ B^T) so the result is [1, TB]: batch on the lane axis, i.e.
    # lane-dense output stores instead of a fully masked [TB, 1] column.
    q = lax.dot_general(w3_ref[...], h2,
                        dimension_numbers=(((1,), (1,)), ((), ())),
                        preferred_element_type=jnp.float32)            # [1, TB]
    o_ref[...] = (q + b3_ref[0, 0]).astype(o_ref.dtype)


@functools.partial(jax.jit, static_argnames=("block_b",))
def critic_forward(state, action, params, *, block_b=1024):
    B, state_dim = state.shape
    action_dim = action.shape[1]
    w1s, w1a, b1, w2, b2, w3, b3 = params

    # Batch tile: multiple of 8 when a single tile covers the batch, otherwise a
    # multiple of 128 so the lane-dense output block stays (8,128)-aligned.
    if B <= block_b:
        tb = _round_up(B, 8)
    else:
        tb = block_b                      # block_b must be a multiple of 128
    b_padded = _round_up(B, tb)
    if b_padded != B:
        pad = b_padded - B
        state = jnp.pad(state, ((0, pad), (0, 0)))
        action = jnp.pad(action, ((0, pad), (0, 0)))
    grid = (b_padded // tb,)

    const = lambda i: (0, 0)              # weights/biases: resident, DMA'd once

    out = pl.pallas_call(
        critic_kernel,
        out_shape=jax.ShapeDtypeStruct((1, b_padded), jnp.float32),
        grid=grid,
        in_specs=[
            pl.BlockSpec((tb, state_dim), lambda i: (i, 0)),   # state tile
            pl.BlockSpec((tb, action_dim), lambda i: (i, 0)),  # action tile
            pl.BlockSpec((state_dim, HIDDEN), const),          # W1_state
            pl.BlockSpec((action_dim, HIDDEN), const),         # W1_action
            pl.BlockSpec((1, HIDDEN), const),                  # b1
            pl.BlockSpec((HIDDEN, HIDDEN), const),             # W2
            pl.BlockSpec((1, HIDDEN), const),                  # b2
            pl.BlockSpec((1, HIDDEN), const),                  # W3 ([out, in])
            pl.BlockSpec(memory_space=pltpu.SMEM),             # b3 scalar in SMEM
        ],
        out_specs=pl.BlockSpec((1, tb), lambda i: (0, i)),     # lane-dense output
        compiler_params=pltpu.CompilerParams(
            dimension_semantics=("parallel",)),                # megacore on v7x
    )(state, action, w1s, w1a, b1, w2, b2, w3, b3)

    # (1, B_padded) -> (B, 1); row-major layouts are identical, so this is free.
    return out.reshape(b_padded, 1)[:B]


def init_params(key, state_dim, action_dim):
    """Deterministic init mirroring nn.Linear: U(-1/sqrt(fan_in), 1/sqrt(fan_in))."""
    d_in = state_dim + action_dim
    keys = jax.random.split(key, 7)

    def u(k, shape, fan_in):
        bound = 1.0 / np.sqrt(fan_in)
        return jax.random.uniform(k, shape, jnp.float32, -bound, bound)

    w1s = u(keys[0], (state_dim, HIDDEN), d_in)   # rows of W1 for the state half
    w1a = u(keys[1], (action_dim, HIDDEN), d_in)  # rows of W1 for the action half
    b1 = u(keys[2], (1, HIDDEN), d_in)
    w2 = u(keys[3], (HIDDEN, HIDDEN), HIDDEN)
    b2 = u(keys[4], (1, HIDDEN), HIDDEN)
    w3 = u(keys[5], (1, HIDDEN), HIDDEN)          # PyTorch fc3.weight layout [1, 16]
    b3 = u(keys[6], (1, 1), HIDDEN)
    return (w1s, w1a, b1, w2, b2, w3, b3)


def critic_reference(state, action, params):
    w1s, w1a, b1, w2, b2, w3, b3 = params
    x = jnp.concatenate([state, action], axis=1)
    w1 = jnp.concatenate([w1s, w1a], axis=0)
    h1 = jnp.maximum(x @ w1 + b1, 0.0)
    h2 = jnp.maximum(h1 @ w2 + b2, 0.0)
    return h2 @ w3.T + b3


if __name__ == "__main__":
    key = jax.random.PRNGKey(0)
    k_state, k_action, k_params = jax.random.split(key, 3)

    batch, state_dim, action_dim = 8, 4, 2
    state = jax.random.normal(k_state, (batch, state_dim), jnp.float32)
    action = jax.random.normal(k_action, (batch, action_dim), jnp.float32)
    params = init_params(k_params, state_dim, action_dim)

    # Small-batch path: single tile, grid=(1,).
    q = jax.block_until_ready(critic_forward(state, action, params))
    q_ref = critic_reference(state, action, params)
    np.testing.assert_allclose(np.asarray(q), np.asarray(q_ref), rtol=1e-5, atol=1e-5)

    # Multi-tile path: grid of 3 batch tiles + ragged padding (B=300, TB=128).
    kb_s, kb_a = jax.random.split(jax.random.PRNGKey(1))
    state_b = jax.random.normal(kb_s, (300, state_dim), jnp.float32)
    action_b = jax.random.normal(kb_a, (300, action_dim), jnp.float32)
    q_b = jax.block_until_ready(
        critic_forward(state_b, action_b, params, block_b=128))
    q_b_ref = critic_reference(state_b, action_b, params)
    np.testing.assert_allclose(np.asarray(q_b), np.asarray(q_b_ref),
                               rtol=1e-5, atol=1e-5)

    print("KERNEL_OK")
</pallas_src>

<mosaic_0001>
module attributes {stable_mosaic.version = 11 : i64} {
  func.func @critic_kernel(%arg0: i32, %arg1: memref<8x4xf32, #tpu.memory_space<vmem>>, %arg2: memref<8x2xf32, #tpu.memory_space<vmem>>, %arg3: memref<4x16xf32, #tpu.memory_space<vmem>>, %arg4: memref<2x16xf32, #tpu.memory_space<vmem>>, %arg5: memref<1x16xf32, #tpu.memory_space<vmem>>, %arg6: memref<16x16xf32, #tpu.memory_space<vmem>>, %arg7: memref<1x16xf32, #tpu.memory_space<vmem>>, %arg8: memref<1x16xf32, #tpu.memory_space<vmem>>, %arg9: memref<1x1xf32, #tpu.memory_space<smem>>, %arg10: memref<1x8xf32, #tpu.memory_space<vmem>>) attributes {dimension_semantics = [#tpu.dimension_semantics<parallel>], iteration_bounds = array<i64: 1>, scalar_prefetch = 0 : i64, scratch_operands = 0 : i64, tpu.core_type = #tpu.core_type<tc>, window_params = [{transform_indices = @transform_0, window_bounds = array<i64: 8, 4>}, {transform_indices = @transform_1, window_bounds = array<i64: 8, 2>}, {pipeline_mode = #tpu.pipeline_mode<synchronous>, transform_indices = @transform_2, window_bounds = array<i64: 4, 16>}, {pipeline_mode = #tpu.pipeline_mode<synchronous>, transform_indices = @transform_3, window_bounds = array<i64: 2, 16>}, {pipeline_mode = #tpu.pipeline_mode<synchronous>, transform_indices = @transform_4, window_bounds = array<i64: 1, 16>}, {pipeline_mode = #tpu.pipeline_mode<synchronous>, transform_indices = @transform_5, window_bounds = array<i64: 16, 16>}, {pipeline_mode = #tpu.pipeline_mode<synchronous>, transform_indices = @transform_6, window_bounds = array<i64: 1, 16>}, {pipeline_mode = #tpu.pipeline_mode<synchronous>, transform_indices = @transform_7, window_bounds = array<i64: 1, 16>}, {transform_indices = @transform_8, window_bounds = array<i64: 1, 1>}, {transform_indices = @transform_9, window_bounds = array<i64: 1, 8>}]} {
    %c0 = arith.constant 0 : index
    %c0_0 = arith.constant 0 : index
    %0 = vector.load %arg1[%c0, %c0_0] : memref<8x4xf32, #tpu.memory_space<vmem>>, vector<8x4xf32>
    %c0_1 = arith.constant 0 : index
    %c0_2 = arith.constant 0 : index
    %1 = vector.load %arg3[%c0_1, %c0_2] : memref<4x16xf32, #tpu.memory_space<vmem>>, vector<4x16xf32>
    %cst = arith.constant dense<0.000000e+00> : vector<8x16xf32>
    %2 = tpu.matmul %0, %1, %cst {dimension_numbers = #tpu.dot_dimension_numbers<[1], [0], [0], [1], [0, 0, 1, 1], [], []>} : vector<8x4xf32>, vector<4x16xf32>, vector<8x16xf32> -> vector<8x16xf32>
    %c0_3 = arith.constant 0 : index
    %c0_4 = arith.constant 0 : index
    %3 = vector.load %arg2[%c0_3, %c0_4] : memref<8x2xf32, #tpu.memory_space<vmem>>, vector<8x2xf32>
    %c0_5 = arith.constant 0 : index
    %c0_6 = arith.constant 0 : index
    %4 = vector.load %arg4[%c0_5, %c0_6] : memref<2x16xf32, #tpu.memory_space<vmem>>, vector<2x16xf32>
    %cst_7 = arith.constant dense<0.000000e+00> : vector<8x16xf32>
    %5 = tpu.matmul %3, %4, %cst_7 {dimension_numbers = #tpu.dot_dimension_numbers<[1], [0], [0], [1], [0, 0, 1, 1], [], []>} : vector<8x2xf32>, vector<2x16xf32>, vector<8x16xf32> -> vector<8x16xf32>
    %6 = arith.addf %2, %5 : vector<8x16xf32>
    %c0_8 = arith.constant 0 : index
    %c0_9 = arith.constant 0 : index
    %7 = vector.load %arg5[%c0_8, %c0_9] : memref<1x16xf32, #tpu.memory_space<vmem>>, vector<1x16xf32>
    %8 = vector.broadcast %7 : vector<1x16xf32> to vector<8x16xf32>
    %9 = arith.addf %6, %8 : vector<8x16xf32>
    %cst_10 = arith.constant 0.000000e+00 : f32
    %10 = vector.broadcast %cst_10 : f32 to vector<8x16xf32>
    %11 = arith.maximumf %9, %10 : vector<8x16xf32>
    %c0_11 = arith.constant 0 : index
    %c0_12 = arith.constant 0 : index
    %12 = vector.load %arg6[%c0_11, %c0_12] : memref<16x16xf32, #tpu.memory_space<vmem>>, vector<16x16xf32>
    %cst_13 = arith.constant dense<0.000000e+00> : vector<8x16xf32>
    %13 = tpu.matmul %11, %12, %cst_13 {dimension_numbers = #tpu.dot_dimension_numbers<[1], [0], [0], [1], [0, 0, 1, 1], [], []>} : vector<8x16xf32>, vector<16x16xf32>, vector<8x16xf32> -> vector<8x16xf32>
    %c0_14 = arith.constant 0 : index
    %c0_15 = arith.constant 0 : index
    %14 = vector.load %arg7[%c0_14, %c0_15] : memref<1x16xf32, #tpu.memory_space<vmem>>, vector<1x16xf32>
    %15 = vector.broadcast %14 : vector<1x16xf32> to vector<8x16xf32>
    %16 = arith.addf %13, %15 : vector<8x16xf32>
    %cst_16 = arith.constant 0.000000e+00 : f32
    %17 = vector.broadcast %cst_16 : f32 to vector<8x16xf32>
    %18 = arith.maximumf %16, %17 : vector<8x16xf32>
    %c0_17 = arith.constant 0 : index
    %c0_18 = arith.constant 0 : index
    %19 = vector.load %arg8[%c0_17, %c0_18] : memref<1x16xf32, #tpu.memory_space<vmem>>, vector<1x16xf32>
    %cst_19 = arith.constant dense<0.000000e+00> : vector<1x8xf32>
    %20 = tpu.matmul %19, %18, %cst_19 {dimension_numbers = #tpu.dot_dimension_numbers<[1], [1], [0], [0], [0, 0, 1, 0], [], []>} : vector<1x16xf32>, vector<8x16xf32>, vector<1x8xf32> -> vector<1x8xf32>
    %c0_20 = arith.constant 0 : index
    %c0_21 = arith.constant 0 : index
    %21 = memref.load %arg9[%c0_20, %c0_21] : memref<1x1xf32, #tpu.memory_space<smem>>
    %22 = vector.broadcast %21 : f32 to vector<1x8xf32>
    %23 = arith.addf %20, %22 : vector<1x8xf32>
    %c0_22 = arith.constant 0 : index
    %c0_23 = arith.constant 0 : index
    %24 = vector.load %arg10[%c0_22, %c0_23] : memref<1x8xf32, #tpu.memory_space<vmem>>, vector<1x8xf32>
    tpu.vector_store %arg10[%c0_22, %c0_23], %23 {strides = array<i32>} : memref<1x8xf32, #tpu.memory_space<vmem>>, vector<1x8xf32>,
    return
  }
  func.func @transform_0(%arg0: i32) -> (i32, i32) {
    %c0_i32 = arith.constant 0 : i32
    %c0_i32_0 = arith.constant 0 : i32
    return %arg0, %c0_i32 : i32, i32
  }
  func.func @transform_1(%arg0: i32) -> (i32, i32) {
    %c0_i32 = arith.constant 0 : i32
    %c0_i32_0 = arith.constant 0 : i32
    return %arg0, %c0_i32 : i32, i32
  }
  func.func @transform_2(%arg0: i32) -> (i32, i32) {
    %c0_i32 = arith.constant 0 : i32
    %c0_i32_0 = arith.constant 0 : i32
    %c0_i32_1 = arith.constant 0 : i32
    return %c0_i32, %c0_i32_0 : i32, i32
  }
  func.func @transform_3(%arg0: i32) -> (i32, i32) {
    %c0_i32 = arith.constant 0 : i32
    %c0_i32_0 = arith.constant 0 : i32
    %c0_i32_1 = arith.constant 0 : i32
    return %c0_i32, %c0_i32_0 : i32, i32
  }
  func.func @transform_4(%arg0: i32) -> (i32, i32) {
    %c0_i32 = arith.constant 0 : i32
    %c0_i32_0 = arith.constant 0 : i32
    %c0_i32_1 = arith.constant 0 : i32
    return %c0_i32, %c0_i32_0 : i32, i32
  }
  func.func @transform_5(%arg0: i32) -> (i32, i32) {
    %c0_i32 = arith.constant 0 : i32
    %c0_i32_0 = arith.constant 0 : i32
    %c0_i32_1 = arith.constant 0 : i32
    return %c0_i32, %c0_i32_0 : i32, i32
  }
  func.func @transform_6(%arg0: i32) -> (i32, i32) {
    %c0_i32 = arith.constant 0 : i32
    %c0_i32_0 = arith.constant 0 : i32
    %c0_i32_1 = arith.constant 0 : i32
    return %c0_i32, %c0_i32_0 : i32, i32
  }
  func.func @transform_7(%arg0: i32) -> (i32, i32) {
    %c0_i32 = arith.constant 0 : i32
    %c0_i32_0 = arith.constant 0 : i32
    %c0_i32_1 = arith.constant 0 : i32
    return %c0_i32, %c0_i32_0 : i32, i32
  }
  func.func @transform_8(%arg0: i32) -> (i32, i32) {
    %c0_i32 = arith.constant 0 : i32
    %c0_i32_0 = arith.constant 0 : i32
    %c0_i32_1 = arith.constant 0 : i32
    return %c0_i32, %c0_i32_0 : i32, i32
  }
  func.func @transform_9(%arg0: i32) -> (i32, i32) {
    %c0_i32 = arith.constant 0 : i32
    %c0_i32_0 = arith.constant 0 : i32
    return %c0_i32, %arg0 : i32, i32
  }
}

</mosaic_0001>

<bundles_post_ra>
// kernel: critic_forward.1
= control target key start
LH: loop header
LB: loop body
LE: loop exit
PB: predicated region body
PF: predicated region fallthrough
CT: control target
= control target key end

     0   :  { %vm42_vm0 = vcmask 1041408   ;;  %vm70_vm1 = vcmask 1043456   ;;  %vm38_vm2 = vcmask 15360   ;;  %vm66_vm3 = vcmask 31744   ;;  %s298_s0 = inlined_call_operand.vmem [shape: f32[8,4], index: 0, kind: input, shape index: {}]   ;;  %s299_s1 = inlined_call_operand.vmem [shape: f32[8,2], index: 1, kind: input, shape index: {}]   ;;  %s300_s2 = inlined_call_operand.vmem [shape: f32[4,16], index: 2, kind: input, shape index: {}]   ;;  %s301_s3 = inlined_call_operand.vmem [shape: f32[2,16], index: 3, kind: input, shape index: {}]   ;;  %s302_s4 = inlined_call_operand.vmem [shape: f32[1,16], index: 4, kind: input, shape index: {}]   ;;  %s303_s5 = inlined_call_operand.vmem [shape: f32[16,16], index: 5, kind: input, shape index: {}]   ;;  %s304_s6 = inlined_call_operand.vmem [shape: f32[1,16], index: 6, kind: input, shape index: {}]   ;;  %s305_s7 = inlined_call_operand.vmem [shape: f32[1,16], index: 7, kind: input, shape index: {}]   ;;  %s306_s8 = inlined_call_operand.<no memory space> [shape: f32[1,1], index: 8, kind: input, shape index: {}]   ;;  %s307_s9 = inlined_call_operand.hbm [shape: f32[1,8], index: 9, kind: output, shape index: {}]  }
   0x1   :  { %v37_v0 = vld [vmem:[%s301_s3] sm:$0x3] }
   0x2   :  { %v35_v1 = vld [vmem:[%s300_s2] sm:$0xf]  ;;  %178 = vmatpush.msk.msra.mxu0 %vm42_vm0, %v37_v0 }
   0x3   :  { %180 = vmatpush.msk.msra.mxu1 %vm70_vm1, %v35_v1  ;;  %v36_v2 = vld [vmem:[%s299_s1] sm:$0xff] }
   0x4   :  { %v34_v3 = vld [vmem:[%s298_s0] sm:$0xff]  ;;  %179 = vmatmul.msk.f32.vlgmr.msra.gmra.mxu0 %vm38_vm2, %v36_v2 }
   0x5   :  { %181 = vmatmul.msk.f32.vlgmr.msra.gmra.mxu1 %vm66_vm3, %v34_v3 }
   0x6   :  { %15 = vsyncpa [#allocation4], 0  ;;  %v101_v4 = vld [vmem:[%s303_s5 + $0x8] sm:$0xff]  ;;  %v100_v5 = vld [vmem:[%s303_s5] sm:$0xff]  ;;  %vm106_vm4 = vcmask 130048   ;;  %v133_v17 = vstv %s306_s8  ;;  %s214_s23 = smov [#allocation3]  }
   0x7   :  { %124 = vmatpush.msra.mxu2 %v101_v4  ;;  %v186_v6 = vld [vmem:[%s302_s4] ss:$0 sm:$0xff]  ;;  %s167_s24 = sshll.u32 %s214_s23, 4  ;;  %s169_s27 = sshll.u32 %s307_s9, 4  ;;  %vm160_vm5 = vcmask 57344   ;;  %s168_s24 = int_to_ptr.vmem [resolvable:$true] %s167_s24  ;;  %s170_s27 = int_to_ptr.hbm [resolvable:$true] %s169_s27 }
   0x8   :  { %v187_v12 = vld [vmem:[%s304_s6] ss:$0 sm:$0xff] }
   0x9   :  { %125 = vmatpush.msra.mxu2 %v100_v5  ;;  %v131_v16 = vld [vmem:[%s305_s7] sm:$0x1] }
  0x81   :  { %v63_v7 = vpop.f32.mrf.mxu0 }
  0x82   :  { %v91_v8 = vpop.f32.mrf.mxu1 }
  0x83   :  { %v92_v9 = vadd.f32 %v91_v8, %v63_v7 }
  0x85   :  { %v98_v10 = vadd.f32 %v186_v6, %v92_v9 }
  0x87   :  { %v99_v11 = vmax.f32 %v98_v10, 0.0 }
  0x89   :  { %182 = vmatmul.msk.f32.vlgmr.msra.gmra.mxu2 %vm106_vm4, %v99_v11 }
 0x10c   :  { %v127_v13 = vpop.f32.mrf.mxu2 }
 0x10d   :  { %v128_v14 = vadd.f32 %v187_v12, %v127_v13 }
 0x10f   :  { %v130_v15 = vmax.f32 %v128_v14, 0.0 }
 0x111   :  { %183 = vmatpush.xpose.msk.msra.mxu3 %vm106_vm4, %v130_v15 }
 0x114   :  { %184 = vmatmul.msk.f32.vlgmr.msra.gmra.mxu3 %vm106_vm4, %v131_v16 }
 0x197   :  { %v157_v18 = vpop.f32.mrf.mxu3 }
 0x198   :  { %v158_v19 = vadd.f32 %v157_v18, %v133_v17 }
 0x19a   :  { %161 = vst.msk [vmem:[#allocation3] sm:$0x1] %vm160_vm5, %v158_v19 }
 0x19b   :  { %172 = dma.vmem_to_hbm [thread:$0]  %s168_s24, 16, %s170_s27, [#allocation4]  }
 0x19c   :  { %212 = dma.done.wait [#allocation4], 16  }
 0x19d   :  { %213 = vsyncadd [#allocation4], 4294967280 }
 0x19e   :  { %177 = vsyncpa [#allocation4], 1 }

</bundles_post_ra>
